<compile_context>
chip_gen: v6e
topology: v6e:2x2x1
jax: 0.10.0
libtpu: 0.0.40
codegen_flags: <defaults>
</compile_context>

<pallas_src>
import functools

import jax
import jax.numpy as jnp
from jax.experimental import pallas as pl
from jax.experimental.pallas import tpu as pltpu


def _round_up(x, m):
    return (x + m - 1) // m * m


def _downconv_kernel(w_ref, b_ref, p_ref, o_ref):
    # w_ref: (c_out_p, K) bf16      (grid-invariant)
    # b_ref: (c_out_p, 1) f32       (grid-invariant)
    # p_ref: (1, K, tile_s) bf16    (patches^T, lane axis = spatial)
    # o_ref: (1, c_out_p, tile_s)   (lane-dense, unmasked stores)
    acc = jnp.dot(w_ref[...], p_ref[0], preferred_element_type=jnp.float32)
    acc = jnp.maximum(acc + b_ref[...], 0.0)       # bias + ReLU in f32 (v5e-safe)
    o_ref[0] = acc.astype(o_ref.dtype)


def _vmem_capacity_bytes():
    try:
        return int(pltpu.get_tpu_info().vmem_capacity_bytes)
    except Exception:
        return 64 << 20  # conservative (v7x per-TC VMEM)


def _select_tile_s(tile_s_req, S, n, K, c_out_p, in_itemsize, out_itemsize,
                   vmem_budget):
    """Largest lane-dense spatial tile whose double-buffered footprint fits VMEM."""
    t = _round_up(max(128, min(tile_s_req, _round_up(S, 128))), 128)
    # v7x megacore: with batch==1, make sure the parallel spatial axis has >=2 steps.
    if n == 1 and S > 128:
        t = min(t, _round_up(pl.cdiv(S, 2), 128))

    def footprint(ts):
        w_b = 2 * c_out_p * K * in_itemsize        # weight (assume double-buffered)
        b_b = 2 * c_out_p * 4                      # bias
        p_b = 2 * K * ts * in_itemsize             # patch stream, double-buffered
        o_b = 2 * c_out_p * ts * out_itemsize      # output, double-buffered
        acc = c_out_p * ts * 4                     # f32 accumulator
        return w_b + b_b + p_b + o_b + acc

    while t > 128 and footprint(t) > vmem_budget:
        t -= 128
    return t, footprint(t)


@functools.partial(jax.jit,
                   static_argnames=("stride", "tile_s", "out_dtype", "compute_dtype"))
def downsampling_conv_block(x, weight, bias, *, stride=2, tile_s=1024,
                            out_dtype=jnp.bfloat16, compute_dtype=jnp.bfloat16):
    """x: (N, C_in, D, H, W) f32; weight: (C_out, C_in, s, s, s); bias: (C_out,).

    MXU inputs are cast to `compute_dtype` (bf16 by default) with f32 accumulation;
    output is written in `out_dtype` (pass jnp.float32 for the exact PyTorch f32
    contract).
    """
    n, c_in, d, h, w = x.shape
    c_out = weight.shape[0]
    s = stride
    do, ho, wo = d // s, h // s, w // s
    # VALID conv with k == s: drop trailing remainders (matches PyTorch / lax).
    x = x[:, :, :do * s, :ho * s, :wo * s]
    S = do * ho * wo
    K = c_in * s * s * s

    out_dtype = jnp.dtype(out_dtype)
    compute_dtype = jnp.dtype(compute_dtype)
    out_itemsize = out_dtype.itemsize
    in_itemsize = compute_dtype.itemsize

    # Pad c_out to a sublane-dense multiple for the packed output dtype
    # (8 for f32, 16 for bf16): keeps stores unmasked and vreg packing regular.
    c_out_p = _round_up(c_out, max(8, 32 // out_itemsize))
    pad_c = c_out_p - c_out

    w_mat = jnp.pad(weight.reshape(c_out, K), ((0, pad_c), (0, 0)))
    w_mat = w_mat.astype(compute_dtype)                                  # (c_out_p, K)
    b_mat = jnp.pad(bias, (0, pad_c)).reshape(c_out_p, 1).astype(jnp.float32)

    # Transposed patch matrix P^T : (N, K, S).
    #   K order = (c_in, kd, kh, kw) -> matches weight.reshape(c_out, K)
    #   S order = (do, ho, wo)       -> kernel output is already NC(S) order.
    # With allow_input_fusion on this operand, XLA may fuse this producer into the
    # pallas_call's per-block input read instead of materializing it in HBM.
    pt = x.reshape(n, c_in, do, s, ho, s, wo, s)
    pt = pt.transpose(0, 1, 3, 5, 7, 2, 4, 6)      # (n, c_in, kd, kh, kw, do, ho, wo)
    pt = pt.reshape(n, K, S).astype(compute_dtype)

    # VMEM-aware lane-dense spatial tiling (v7x: 64 MiB physical; v5e scoped
    # default is only 16 MiB, so the limit is raised explicitly below).
    vmem_cap = _vmem_capacity_bytes()
    tile_s, fp = _select_tile_s(tile_s, S, n, K, c_out_p,
                                in_itemsize, out_itemsize, vmem_cap // 2)
    vmem_limit = int(min(max(fp * 2 + (4 << 20), 32 << 20), int(vmem_cap * 0.9)))

    s_pad = _round_up(S, tile_s)
    if s_pad != S:
        pt = jnp.pad(pt, ((0, 0), (0, 0), (0, s_pad - S)))
    grid = (n, s_pad // tile_s)

    cost = pl.CostEstimate(
        flops=2 * n * s_pad * K * c_out_p,
        transcendentals=0,
        bytes_accessed=(n * K * s_pad * in_itemsize
                        + c_out_p * K * in_itemsize
                        + c_out_p * 4
                        + n * c_out_p * s_pad * out_itemsize),
    )

    out_flat = pl.pallas_call(
        _downconv_kernel,
        out_shape=jax.ShapeDtypeStruct((n, c_out_p, s_pad), out_dtype),
        grid_spec=pltpu.PrefetchScalarGridSpec(
            num_scalar_prefetch=0,
            grid=grid,
            in_specs=[
                pl.BlockSpec((c_out_p, K), lambda b, j: (0, 0)),        # weight
                pl.BlockSpec((c_out_p, 1), lambda b, j: (0, 0)),        # bias
                pl.BlockSpec((1, K, tile_s), lambda b, j: (b, 0, j)),   # patches^T
            ],
            out_specs=pl.BlockSpec((1, c_out_p, tile_s), lambda b, j: (b, 0, j)),
        ),
        compiler_params=pltpu.CompilerParams(
            dimension_semantics=("parallel", "parallel"),
            allow_input_fusion=[False, False, True],   # fuse the patch-build producer
            vmem_limit_bytes=vmem_limit,
        ),
        cost_estimate=cost,
    )(w_mat, b_mat, pt)

    # (N, C_out_p, S_pad) -> (N, C_out, Do, Ho, Wo): slice + pure reshape, no transpose.
    out = out_flat[:, :c_out, :S].reshape(n, c_out, do, ho, wo)
    return out


def reference_downconv(x, weight, bias, *, stride=2):
    # Pure-JAX reference (lax conv, VALID) for correctness check.
    out = jax.lax.conv_general_dilated(
        x, weight,
        window_strides=(stride, stride, stride),
        padding="VALID",
        dimension_numbers=("NCDHW", "OIDHW", "NCDHW"),
    )
    out = out + bias.reshape(1, -1, 1, 1, 1)
    return jnp.maximum(out, 0.0)


if __name__ == "__main__":
    key = jax.random.PRNGKey(0)
    k_x, k_w, k_b = jax.random.split(key, 3)

    n, c_in, c_out = 2, 4, 8
    d = h = w = 16
    stride = 2

    x = jax.random.normal(k_x, (n, c_in, d, h, w), dtype=jnp.float32)
    # Deterministic synthetic params (shapes match nn.Conv3d(c_in, c_out, 2, stride=2)).
    fan_in = c_in * stride * stride * stride
    weight = jax.random.normal(k_w, (c_out, c_in, stride, stride, stride),
                               dtype=jnp.float32) * (1.0 / fan_in) ** 0.5
    bias = jax.random.normal(k_b, (c_out,), dtype=jnp.float32) * 0.1

    # Reference on bf16-quantized inputs (the kernel feeds bf16 to the MXU with f32
    # accumulation), so the comparison is apples-to-apples.
    xq = x.astype(jnp.bfloat16).astype(jnp.float32)
    wq = weight.astype(jnp.bfloat16).astype(jnp.float32)
    ref = reference_downconv(xq, wq, bias, stride=stride)

    # 1) f32 output path (exact module contract).
    out_f32 = jax.block_until_ready(
        downsampling_conv_block(x, weight, bias, stride=stride, out_dtype=jnp.float32))
    assert out_f32.shape == (n, c_out, d // stride, h // stride, w // stride)
    assert out_f32.dtype == jnp.float32
    assert jnp.allclose(out_f32, ref, atol=1e-3, rtol=1e-3), "f32 path mismatch"

    # 2) Default perf path (bf16 write-back, f32 accumulation).
    out_bf16 = jax.block_until_ready(
        downsampling_conv_block(x, weight, bias, stride=stride))
    assert out_bf16.dtype == jnp.bfloat16
    assert jnp.allclose(out_bf16.astype(jnp.float32), ref, atol=3e-2, rtol=3e-2), \
        "bf16 path mismatch"

    # 3) Odd spatial dims (VALID conv drops the trailing plane, like PyTorch).
    d2 = h2 = w2 = 15
    x_odd = jax.random.normal(k_x, (n, c_in, d2, h2, w2), dtype=jnp.float32)
    xq_odd = x_odd.astype(jnp.bfloat16).astype(jnp.float32)
    ref_odd = reference_downconv(xq_odd, wq, bias, stride=stride)
    out_odd = jax.block_until_ready(
        downsampling_conv_block(x_odd, weight, bias, stride=stride,
                                out_dtype=jnp.float32))
    assert out_odd.shape == ref_odd.shape == (n, c_out, 7, 7, 7)
    assert jnp.allclose(out_odd, ref_odd, atol=1e-3, rtol=1e-3), "odd-dim mismatch"

    print("KERNEL_OK")
</pallas_src>

<mosaic_0001>
module attributes {stable_mosaic.version = 11 : i64} {
  func.func @_downconv_kernel(%arg0: i32, %arg1: i32, %arg2: memref<8x32xbf16, #tpu.memory_space<vmem>>, %arg3: memref<8x1xf32, #tpu.memory_space<vmem>>, %arg4: memref<1x32x512xbf16, #tpu.memory_space<vmem>>, %arg5: memref<1x8x512xf32, #tpu.memory_space<vmem>>) attributes {dimension_semantics = [#tpu.dimension_semantics<parallel>, #tpu.dimension_semantics<parallel>], iteration_bounds = array<i64: 2, 1>, scalar_prefetch = 0 : i64, scratch_operands = 0 : i64, tpu.core_type = #tpu.core_type<tc>, window_params = [{pipeline_mode = #tpu.pipeline_mode<synchronous>, transform_indices = @transform_0, window_bounds = array<i64: 8, 32>}, {pipeline_mode = #tpu.pipeline_mode<synchronous>, transform_indices = @transform_1, window_bounds = array<i64: 8, 1>}, {transform_indices = @transform_2, window_bounds = array<i64: 1, 32, 512>}, {transform_indices = @transform_3, window_bounds = array<i64: 1, 8, 512>}]} {
    %c0 = arith.constant 0 : index
    %c0_0 = arith.constant 0 : index
    %0 = vector.load %arg2[%c0, %c0_0] : memref<8x32xbf16, #tpu.memory_space<vmem>>, vector<8x32xbf16>
    %c0_1 = arith.constant 0 : index
    %c0_2 = arith.constant 0 : index
    %c0_3 = arith.constant 0 : index
    %1 = vector.load %arg4[%c0_1, %c0_2, %c0_3] : memref<1x32x512xbf16, #tpu.memory_space<vmem>>, vector<1x32x512xbf16>
    %2 = vector.shape_cast %1 : vector<1x32x512xbf16> to vector<32x512xbf16>
    %cst = arith.constant dense<0.000000e+00> : vector<8x512xf32>
    %3 = tpu.matmul %0, %2, %cst {dimension_numbers = #tpu.dot_dimension_numbers<[1], [0], [0], [1], [0, 0, 1, 1], [], []>} : vector<8x32xbf16>, vector<32x512xbf16>, vector<8x512xf32> -> vector<8x512xf32>
    %c0_4 = arith.constant 0 : index
    %c0_5 = arith.constant 0 : index
    %4 = vector.load %arg3[%c0_4, %c0_5] : memref<8x1xf32, #tpu.memory_space<vmem>>, vector<8x1xf32>
    %5 = vector.broadcast %4 : vector<8x1xf32> to vector<8x512xf32>
    %6 = arith.addf %3, %5 : vector<8x512xf32>
    %cst_6 = arith.constant 0.000000e+00 : f32
    %7 = vector.broadcast %cst_6 : f32 to vector<8x512xf32>
    %8 = arith.maximumf %6, %7 : vector<8x512xf32>
    %c0_7 = arith.constant 0 : index
    %c0_8 = arith.constant 0 : index
    %c0_9 = arith.constant 0 : index
    %9 = vector.load %arg5[%c0_7, %c0_8, %c0_9] : memref<1x8x512xf32, #tpu.memory_space<vmem>>, vector<1x8x512xf32>
    %10 = vector.shape_cast %9 : vector<1x8x512xf32> to vector<8x512xf32>
    %11 = vector.shape_cast %8 : vector<8x512xf32> to vector<1x8x512xf32>
    tpu.vector_store %arg5[%c0_7, %c0_8, %c0_9], %11 {strides = array<i32>} : memref<1x8x512xf32, #tpu.memory_space<vmem>>, vector<1x8x512xf32>,
    return
  }
  func.func @transform_0(%arg0: i32, %arg1: i32) -> (i32, i32) {
    %c0_i32 = arith.constant 0 : i32
    %c0_i32_0 = arith.constant 0 : i32
    %c0_i32_1 = arith.constant 0 : i32
    return %c0_i32, %c0_i32_0 : i32, i32
  }
  func.func @transform_1(%arg0: i32, %arg1: i32) -> (i32, i32) {
    %c0_i32 = arith.constant 0 : i32
    %c0_i32_0 = arith.constant 0 : i32
    %c0_i32_1 = arith.constant 0 : i32
    return %c0_i32, %c0_i32_0 : i32, i32
  }
  func.func @transform_2(%arg0: i32, %arg1: i32) -> (i32, i32, i32) {
    %c0_i32 = arith.constant 0 : i32
    %c0_i32_0 = arith.constant 0 : i32
    return %arg0, %c0_i32, %arg1 : i32, i32, i32
  }
  func.func @transform_3(%arg0: i32, %arg1: i32) -> (i32, i32, i32) {
    %c0_i32 = arith.constant 0 : i32
    %c0_i32_0 = arith.constant 0 : i32
    return %arg0, %c0_i32, %arg1 : i32, i32, i32
  }
}

</mosaic_0001>

<bundles_post_ra>
// kernel: downsampling_conv_block.1
= control target key start
LH: loop header
LB: loop body
LE: loop exit
PB: predicated region body
PF: predicated region fallthrough
CT: control target
= control target key end

     0   :  { %s553_s12 = smov 0   ;;  %s555_s13 = smov 0   ;;  %s596_s0 = inlined_call_operand.vmem [shape: bf16[8,32], index: 0, kind: input, shape index: {}]   ;;  %s597_s1 = inlined_call_operand.vmem [shape: f32[8,1], index: 1, kind: input, shape index: {}]   ;;  %s598_s2 = inlined_call_operand.vmem [shape: bf16[2,32,512], index: 2, kind: input, shape index: {}]   ;;  %s599_s3 = inlined_call_operand.vmem [shape: f32[2,8,512], index: 3, kind: output, shape index: {}]  }
   0x1   :  { %s557_s14 = smov 0  }
   0x2 LB: > { %s25_s15 = sadd.s32 1, %s526_s13  ;;  %p451_p0 = scmp.ge.s32.totalorder %s530_s14, 1  ;;  %s530_s14 = sphi %s557_s14, %s13_s14   ;;  %s526_s13 = sphi %s555_s13, %s601_s13   ;;  %s522_s12 = sphi %s553_s12, %s600_s12  }
   0x3   : > { %p27_p1 = scmp.ge.s32.totalorder %s25_s15, 2  ;;  %p158_p2 = scmp.lt.s32.totalorder %s530_s14, 3 }
   0x5   : > { %s603_s15 = smov (%p27_p1, %s25_s15), 0  ;;  %p159_p3 = pnand %p451_p0, %p158_p2 }
   0x6   : > { %p191_p4 = scmp.lt.s32.totalorder (!%p159_p3), %s522_s12, 1 }
   0x7   : > { %162 = sbr.rel (%p159_p3) target bundleno = 224 (0xe0), region = 32 }
   0xc   : > { %v220_v0 = vld [vmem:[%s597_s1] sm:$0xff]  ;;  %v532_v1 = vmov 0   ;;  %s605_s12 = smov (!%p191_p4, %s522_s12), 1  ;;  %vm266_vm0 = vcmask 261120  }
   0xd   : > { %302 = vmatprep.mubr.bf16.mxu0 %v532_v1  ;;  %343 = vmatprep.mubr.bf16.mxu1 %v532_v1  ;;  %s468_s18 = sshll.u32 %s605_s12, 6  ;;  %v211_v10 = vld [vmem:[%s596_s0] sm:$0xf]  ;;  %s469_s24 = sshll.u32 %s605_s12, 5 }
   0xe   : > { %495 = vset.pattern.permute.xlu0 %v532_v1  ;;  %s198_s21 = scalar_lea.vmem %s598_s2, %s468_s18  ;;  %s208_s27 = scalar_lea.vmem %s599_s3, %s469_s24 }
   0xf   : > { %223 = vperm.xlu0 %495, %v220_v0   ;;  %v496_v2 = vld [vmem:[%s198_s21 + $0x24] ss:$16 sps:$4 sm:$0xff]   ;;  %v498_v3 = vld [vmem:[%s198_s21 + $0x2c] ss:$16 sps:$4 sm:$0xff]   ;;  %v500_v4 = vld [vmem:[%s198_s21 + $0x20] ss:$16 sps:$4 sm:$0xff]  }
  0x10   : > { %282 = vmatprep.subr.bf16.mxu0 %v496_v2  ;;  %v501_v5 = vld [vmem:[%s198_s21 + $0x28] ss:$16 sps:$4 sm:$0xff]   ;;  %323 = vmatprep.subr.bf16.mxu1 %v498_v3  ;;  %v502_v6 = vld [vmem:[%s198_s21 + $0x4] ss:$16 sps:$4 sm:$0xff]   ;;  %v504_v7 = vld [vmem:[%s198_s21 + $0xc] ss:$16 sps:$4 sm:$0xff]  }
  0x11   : > { %283 = vmatpush1.bf16.msra.mxu0 %v500_v4  ;;  %324 = vmatpush1.bf16.msra.mxu1 %v501_v5  ;;  %v506_v8 = vld [vmem:[%s198_s21] ss:$16 sps:$4 sm:$0xff]   ;;  %v507_v9 = vld [vmem:[%s198_s21 + $0x8] ss:$16 sps:$4 sm:$0xff]  }
  0x12   : > { %284 = vmatprep.subr.bf16.mxu0 %v502_v6  ;;  %325 = vmatprep.subr.bf16.mxu1 %v504_v7 }
  0x15   : > { %285 = vmatpush1.bf16.msra.mxu0 %v506_v8  ;;  %326 = vmatpush1.bf16.msra.mxu1 %v507_v9 }
  0x18   : > { %464 = vmatmul.mubr.msk.bf16.vlgmr.msra.gmra.mxu0 %vm266_vm0, %v211_v10  ;;  %465 = vmatmul.mubr.msk.bf16.vlgmr.msra.gmra.mxu1 %vm266_vm0, %v211_v10 }
  0x8a   : > { %v224_v11 = vpop.permute.xlu0 %223 }
  0xd8   : > { %v304_v12 = vpop.f32.mrf.mxu0  ;;  %v345_v13 = vpop.f32.mrf.mxu1 }
  0xd9   : > { %v305_v14 = vadd.f32 %v304_v12, %v224_v11  ;;  %v346_v15 = vadd.f32 %v345_v13, %v224_v11 }
  0xda   : > { %v306_v16 = vpop.f32.mrf.mxu0  ;;  %v347_v17 = vpop.f32.mrf.mxu1 }
  0xdb   : > { %v352_v18 = vmax.f32 %v305_v14, 0.0  ;;  %v354_v19 = vmax.f32 %v346_v15, 0.0  ;;  %v307_v20 = vadd.f32 %v306_v16, %v224_v11  ;;  %v348_v21 = vadd.f32 %v347_v17, %v224_v11 }
  0xdc   : > { %v308_v22 = vpop.f32.mrf.mxu0  ;;  %v349_v23 = vpop.f32.mrf.mxu1 }
  0xdd   : > { %356 = vst [vmem:[%s208_s27] sm:$0xff] %v352_v18  ;;  %358 = vst [vmem:[%s208_s27 + $0x10] sm:$0xff] %v354_v19  ;;  %v353_v24 = vmax.f32 %v307_v20, 0.0  ;;  %v355_v25 = vmax.f32 %v348_v21, 0.0 }
  0xde   : > { %v309_v26 = vpop.f32.mrf.mxu0  ;;  %v350_v27 = vpop.f32.mrf.mxu1 }
  0xdf   : > { %357 = vst [vmem:[%s208_s27 + $0x8] sm:$0xff] %v353_v24  ;;  %359 = vst [vmem:[%s208_s27 + $0x18] sm:$0xff] %v355_v25 }
  0xe0 PF: > { %s13_s14 = sadd.s32 1, %s530_s14   ;;  %s600_s12 = smov %s526_s13 }
  0xe1   : > { %p10_p5 = scmp.ge.s32.totalorder %s13_s14, 4   ;;  %s601_s13 = smov %s603_s15 }
  0xe3   :  { %12 = sbr.rel (!%p10_p5) target bundleno = 2 (0x2), region = 62 }

</bundles_post_ra>
